<compile_context>
chip_gen: v6e
topology: v6e:2x2x1
jax: 0.10.0
libtpu: 0.0.40
codegen_flags: <defaults>
</compile_context>

<pallas_src>
import jax
import jax.numpy as jnp
from jax import lax
from jax.experimental import pallas as pl
from jax.experimental.pallas import tpu as pltpu

C, H, W = 3, 5, 5
IN_FEAT = C * H * W          # 75
HW = H * W                   # 25
HID = 100                    # logical hidden width (PyTorch)
HID_PAD = 128                # padded hidden width (lane-dense / exact MXU tile)
OUT = 1
EPS = 1e-5
TN_MAX = 1024                # batch-tile rows (multiple of 256; fits all VMEMs)


def _model2_kernel(x_ref, a_ref, w1_ref, b1_ref, w2_ref, b2_ref, w3_ref, b3_ref,
                   w4_ref, b4_ref, w5_ref, b5_ref, o_ref):
    x = x_ref[...]                                        # (TN, 75) f32
    a = a_ref[...]                                        # (75, 75) block-diag 1/25

    # ---- InstanceNorm2d(3): per-sample, per-channel stats via MXU matmuls ----
    mean_b = jnp.dot(x, a, preferred_element_type=jnp.float32)       # (TN, 75)
    xc = x - mean_b
    var_b = jnp.dot(xc * xc, a, preferred_element_type=jnp.float32)  # biased var
    xn = xc * lax.rsqrt(var_b + EPS)

    # ---- MLP: 4x (Linear -> ReLU) + final Linear (hidden padded to 128) ----
    h = jnp.maximum(
        jnp.dot(xn, w1_ref[...], preferred_element_type=jnp.float32) + b1_ref[...], 0.0)
    h = jnp.maximum(
        jnp.dot(h, w2_ref[...], preferred_element_type=jnp.float32) + b2_ref[...], 0.0)
    h = jnp.maximum(
        jnp.dot(h, w3_ref[...], preferred_element_type=jnp.float32) + b3_ref[...], 0.0)
    h = jnp.maximum(
        jnp.dot(h, w4_ref[...], preferred_element_type=jnp.float32) + b4_ref[...], 0.0)
    o_ref[...] = (
        jnp.dot(h, w5_ref[...], preferred_element_type=jnp.float32) + b5_ref[...])


def _make_avg_matrix():
    """(75,75) block-diagonal matrix: 1/25 within each channel's 25x25 block."""
    blk = jnp.full((HW, HW), 1.0 / HW, jnp.float32)
    return jax.scipy.linalg.block_diag(blk, blk, blk).astype(jnp.float32)


def _pad_params(params):
    """Zero-pad hidden dim 100 -> 128 (keeps semantics; ReLU(0)=0)."""
    w1, b1, w2, b2, w3, b3, w4, b4, w5, b5 = params
    def pad_cols(w, to):
        return jnp.pad(w, ((0, 0), (0, to - w.shape[1])))
    def pad_rows(w, to):
        return jnp.pad(w, ((0, to - w.shape[0]), (0, 0)))
    w1p = pad_cols(w1, HID_PAD)                       # (75, 128)
    w2p = pad_cols(pad_rows(w2, HID_PAD), HID_PAD)    # (128, 128)
    w3p = pad_cols(pad_rows(w3, HID_PAD), HID_PAD)
    w4p = pad_cols(pad_rows(w4, HID_PAD), HID_PAD)
    w5p = pad_rows(w5, HID_PAD)                       # (128, 1)
    b1p = pad_cols(b1, HID_PAD)
    b2p = pad_cols(b2, HID_PAD)
    b3p = pad_cols(b3, HID_PAD)
    b4p = pad_cols(b4, HID_PAD)
    return (w1p, b1p, w2p, b2p, w3p, b3p, w4p, b4p, w5p, b5)


def model2_forward(x_nchw, params):
    """x_nchw: (N, 3, 5, 5) float32. Returns (N, 1) float32."""
    n = x_nchw.shape[0]
    x_flat = x_nchw.reshape(n, IN_FEAT).astype(jnp.float32)  # same as torch .view

    # Batch tiling: round N up to a multiple of the tile size.
    if n <= TN_MAX:
        tn = max(8, -(-n // 8) * 8)          # single tile, multiple of 8
    else:
        tn = TN_MAX
    n_pad = -(-n // tn) * tn
    if n_pad != n:
        x_flat = jnp.pad(x_flat, ((0, n_pad - n), (0, 0)))
    num_tiles = n_pad // tn

    a_mat = _make_avg_matrix()
    w1, b1, w2, b2, w3, b3, w4, b4, w5, b5 = _pad_params(params)
    consts = (a_mat, w1, b1, w2, b2, w3, b3, w4, b4, w5, b5)

    def const_spec(arr):
        nd = arr.ndim
        return pl.BlockSpec(arr.shape, lambda i, _nd=nd: (0,) * _nd)

    in_specs = [pl.BlockSpec((tn, IN_FEAT), lambda i: (i, 0))]
    in_specs += [const_spec(c) for c in consts]

    # Advisory cost estimate for XLA scheduling around the custom call.
    flops_per_row = 2 * (2 * IN_FEAT * IN_FEAT            # norm matmuls
                         + IN_FEAT * HID_PAD
                         + 3 * HID_PAD * HID_PAD
                         + HID_PAD * OUT)
    weight_bytes = sum(int(c.size) * 4 for c in consts)
    cost = pl.CostEstimate(
        flops=int(n_pad * flops_per_row),
        transcendentals=int(n_pad * IN_FEAT),
        bytes_accessed=int(n_pad * (IN_FEAT + OUT) * 4 + weight_bytes))

    out = pl.pallas_call(
        _model2_kernel,
        out_shape=jax.ShapeDtypeStruct((n_pad, OUT), jnp.float32),
        grid=(num_tiles,),
        in_specs=in_specs,
        out_specs=pl.BlockSpec((tn, OUT), lambda i: (i, 0)),
        compiler_params=pltpu.CompilerParams(
            dimension_semantics=("parallel",)),
        cost_estimate=cost,
    )(x_flat, *consts)
    return out[:n]


def _xavier_uniform(key, fan_in, fan_out, gain):
    # PyTorch xavier_uniform_: U(-a, a), a = gain * sqrt(6 / (fan_in + fan_out)).
    bound = gain * (6.0 / (fan_in + fan_out)) ** 0.5
    # Stored as (in, out) so the kernel computes x @ W (== x @ W_torch.T).
    return jax.random.uniform(key, (fan_in, fan_out), jnp.float32, -bound, bound)


def make_params(key):
    gain = 0.1 * (2.0 ** 0.5)   # 0.1 * calculate_gain('relu')
    ks = jax.random.split(key, 5)
    dims = [(IN_FEAT, HID), (HID, HID), (HID, HID), (HID, HID), (HID, OUT)]
    params = []
    for k, (fi, fo) in zip(ks, dims):
        params.append(_xavier_uniform(k, fi, fo, gain))
        params.append(jnp.zeros((1, fo), jnp.float32))   # bias.fill_(0)
    return tuple(params)


def _reference(x_nchw, params):
    # Pure-JAX reference (unpadded weights) for sanity checking.
    n = x_nchw.shape[0]
    mean = x_nchw.mean(axis=(2, 3), keepdims=True)
    var = x_nchw.var(axis=(2, 3), keepdims=True)
    xn = (x_nchw - mean) * lax.rsqrt(var + EPS)
    h = xn.reshape(n, IN_FEAT)
    w1, b1, w2, b2, w3, b3, w4, b4, w5, b5 = params
    h = jnp.maximum(h @ w1 + b1, 0.0)
    h = jnp.maximum(h @ w2 + b2, 0.0)
    h = jnp.maximum(h @ w3 + b3, 0.0)
    h = jnp.maximum(h @ w4 + b4, 0.0)
    return h @ w5 + b5


if __name__ == "__main__":
    key = jax.random.PRNGKey(0)
    k_x, k_p = jax.random.split(key)

    batch = 2
    x = jax.random.normal(k_x, (batch, C, H, W), jnp.float32)
    params = make_params(k_p)

    out = model2_forward(x, params)
    out = jax.block_until_ready(out)

    ref = _reference(x, params)
    assert out.shape == (batch, OUT)
    assert jnp.allclose(out, ref, atol=1e-4, rtol=1e-4)

    print("KERNEL_OK")
</pallas_src>

<mosaic_0001>
module attributes {stable_mosaic.version = 11 : i64} {
  func.func @_model2_kernel(%arg0: i32, %arg1: memref<8x75xf32, #tpu.memory_space<vmem>>, %arg2: memref<75x75xf32, #tpu.memory_space<vmem>>, %arg3: memref<75x128xf32, #tpu.memory_space<vmem>>, %arg4: memref<1x128xf32, #tpu.memory_space<vmem>>, %arg5: memref<128x128xf32, #tpu.memory_space<vmem>>, %arg6: memref<1x128xf32, #tpu.memory_space<vmem>>, %arg7: memref<128x128xf32, #tpu.memory_space<vmem>>, %arg8: memref<1x128xf32, #tpu.memory_space<vmem>>, %arg9: memref<128x128xf32, #tpu.memory_space<vmem>>, %arg10: memref<1x128xf32, #tpu.memory_space<vmem>>, %arg11: memref<128x1xf32, #tpu.memory_space<vmem>>, %arg12: memref<1x1xf32, #tpu.memory_space<vmem>>, %arg13: memref<8x1xf32, #tpu.memory_space<vmem>>) attributes {dimension_semantics = [#tpu.dimension_semantics<parallel>], iteration_bounds = array<i64: 1>, scalar_prefetch = 0 : i64, scratch_operands = 0 : i64, tpu.core_type = #tpu.core_type<tc>, window_params = [{transform_indices = @transform_0, window_bounds = array<i64: 8, 75>}, {pipeline_mode = #tpu.pipeline_mode<synchronous>, transform_indices = @transform_1, window_bounds = array<i64: 75, 75>}, {pipeline_mode = #tpu.pipeline_mode<synchronous>, transform_indices = @transform_2, window_bounds = array<i64: 75, 128>}, {pipeline_mode = #tpu.pipeline_mode<synchronous>, transform_indices = @transform_3, window_bounds = array<i64: 1, 128>}, {pipeline_mode = #tpu.pipeline_mode<synchronous>, transform_indices = @transform_4, window_bounds = array<i64: 128, 128>}, {pipeline_mode = #tpu.pipeline_mode<synchronous>, transform_indices = @transform_5, window_bounds = array<i64: 1, 128>}, {pipeline_mode = #tpu.pipeline_mode<synchronous>, transform_indices = @transform_6, window_bounds = array<i64: 128, 128>}, {pipeline_mode = #tpu.pipeline_mode<synchronous>, transform_indices = @transform_7, window_bounds = array<i64: 1, 128>}, {pipeline_mode = #tpu.pipeline_mode<synchronous>, transform_indices = @transform_8, window_bounds = array<i64: 128, 128>}, {pipeline_mode = #tpu.pipeline_mode<synchronous>, transform_indices = @transform_9, window_bounds = array<i64: 1, 128>}, {pipeline_mode = #tpu.pipeline_mode<synchronous>, transform_indices = @transform_10, window_bounds = array<i64: 128, 1>}, {pipeline_mode = #tpu.pipeline_mode<synchronous>, transform_indices = @transform_11, window_bounds = array<i64: 1, 1>}, {transform_indices = @transform_12, window_bounds = array<i64: 8, 1>}]} {
    %c0 = arith.constant 0 : index
    %c0_0 = arith.constant 0 : index
    %0 = vector.load %arg1[%c0, %c0_0] : memref<8x75xf32, #tpu.memory_space<vmem>>, vector<8x75xf32>
    %c0_1 = arith.constant 0 : index
    %c0_2 = arith.constant 0 : index
    %1 = vector.load %arg2[%c0_1, %c0_2] : memref<75x75xf32, #tpu.memory_space<vmem>>, vector<75x75xf32>
    %cst = arith.constant dense<0.000000e+00> : vector<8x75xf32>
    %2 = tpu.matmul %0, %1, %cst {dimension_numbers = #tpu.dot_dimension_numbers<[1], [0], [0], [1], [0, 0, 1, 1], [], []>} : vector<8x75xf32>, vector<75x75xf32>, vector<8x75xf32> -> vector<8x75xf32>
    %3 = arith.subf %0, %2 : vector<8x75xf32>
    %4 = arith.mulf %3, %3 : vector<8x75xf32>
    %cst_3 = arith.constant dense<0.000000e+00> : vector<8x75xf32>
    %5 = tpu.matmul %4, %1, %cst_3 {dimension_numbers = #tpu.dot_dimension_numbers<[1], [0], [0], [1], [0, 0, 1, 1], [], []>} : vector<8x75xf32>, vector<75x75xf32>, vector<8x75xf32> -> vector<8x75xf32>
    %cst_4 = arith.constant 9.99999974E-6 : f32
    %6 = vector.broadcast %cst_4 : f32 to vector<8x75xf32>
    %7 = arith.addf %5, %6 : vector<8x75xf32>
    %8 = math.rsqrt %7 : vector<8x75xf32>
    %9 = arith.mulf %3, %8 : vector<8x75xf32>
    %c0_5 = arith.constant 0 : index
    %c0_6 = arith.constant 0 : index
    %10 = vector.load %arg3[%c0_5, %c0_6] : memref<75x128xf32, #tpu.memory_space<vmem>>, vector<75x128xf32>
    %cst_7 = arith.constant dense<0.000000e+00> : vector<8x128xf32>
    %11 = tpu.matmul %9, %10, %cst_7 {dimension_numbers = #tpu.dot_dimension_numbers<[1], [0], [0], [1], [0, 0, 1, 1], [], []>} : vector<8x75xf32>, vector<75x128xf32>, vector<8x128xf32> -> vector<8x128xf32>
    %c0_8 = arith.constant 0 : index
    %c0_9 = arith.constant 0 : index
    %12 = vector.load %arg4[%c0_8, %c0_9] : memref<1x128xf32, #tpu.memory_space<vmem>>, vector<1x128xf32>
    %13 = vector.broadcast %12 : vector<1x128xf32> to vector<8x128xf32>
    %14 = arith.addf %11, %13 : vector<8x128xf32>
    %cst_10 = arith.constant 0.000000e+00 : f32
    %15 = vector.broadcast %cst_10 : f32 to vector<8x128xf32>
    %16 = arith.maximumf %14, %15 : vector<8x128xf32>
    %c0_11 = arith.constant 0 : index
    %c0_12 = arith.constant 0 : index
    %17 = vector.load %arg5[%c0_11, %c0_12] : memref<128x128xf32, #tpu.memory_space<vmem>>, vector<128x128xf32>
    %cst_13 = arith.constant dense<0.000000e+00> : vector<8x128xf32>
    %18 = tpu.matmul %16, %17, %cst_13 {dimension_numbers = #tpu.dot_dimension_numbers<[1], [0], [0], [1], [0, 0, 1, 1], [], []>} : vector<8x128xf32>, vector<128x128xf32>, vector<8x128xf32> -> vector<8x128xf32>
    %c0_14 = arith.constant 0 : index
    %c0_15 = arith.constant 0 : index
    %19 = vector.load %arg6[%c0_14, %c0_15] : memref<1x128xf32, #tpu.memory_space<vmem>>, vector<1x128xf32>
    %20 = vector.broadcast %19 : vector<1x128xf32> to vector<8x128xf32>
    %21 = arith.addf %18, %20 : vector<8x128xf32>
    %cst_16 = arith.constant 0.000000e+00 : f32
    %22 = vector.broadcast %cst_16 : f32 to vector<8x128xf32>
    %23 = arith.maximumf %21, %22 : vector<8x128xf32>
    %c0_17 = arith.constant 0 : index
    %c0_18 = arith.constant 0 : index
    %24 = vector.load %arg7[%c0_17, %c0_18] : memref<128x128xf32, #tpu.memory_space<vmem>>, vector<128x128xf32>
    %cst_19 = arith.constant dense<0.000000e+00> : vector<8x128xf32>
    %25 = tpu.matmul %23, %24, %cst_19 {dimension_numbers = #tpu.dot_dimension_numbers<[1], [0], [0], [1], [0, 0, 1, 1], [], []>} : vector<8x128xf32>, vector<128x128xf32>, vector<8x128xf32> -> vector<8x128xf32>
    %c0_20 = arith.constant 0 : index
    %c0_21 = arith.constant 0 : index
    %26 = vector.load %arg8[%c0_20, %c0_21] : memref<1x128xf32, #tpu.memory_space<vmem>>, vector<1x128xf32>
    %27 = vector.broadcast %26 : vector<1x128xf32> to vector<8x128xf32>
    %28 = arith.addf %25, %27 : vector<8x128xf32>
    %cst_22 = arith.constant 0.000000e+00 : f32
    %29 = vector.broadcast %cst_22 : f32 to vector<8x128xf32>
    %30 = arith.maximumf %28, %29 : vector<8x128xf32>
    %c0_23 = arith.constant 0 : index
    %c0_24 = arith.constant 0 : index
    %31 = vector.load %arg9[%c0_23, %c0_24] : memref<128x128xf32, #tpu.memory_space<vmem>>, vector<128x128xf32>
    %cst_25 = arith.constant dense<0.000000e+00> : vector<8x128xf32>
    %32 = tpu.matmul %30, %31, %cst_25 {dimension_numbers = #tpu.dot_dimension_numbers<[1], [0], [0], [1], [0, 0, 1, 1], [], []>} : vector<8x128xf32>, vector<128x128xf32>, vector<8x128xf32> -> vector<8x128xf32>
    %c0_26 = arith.constant 0 : index
    %c0_27 = arith.constant 0 : index
    %33 = vector.load %arg10[%c0_26, %c0_27] : memref<1x128xf32, #tpu.memory_space<vmem>>, vector<1x128xf32>
    %34 = vector.broadcast %33 : vector<1x128xf32> to vector<8x128xf32>
    %35 = arith.addf %32, %34 : vector<8x128xf32>
    %cst_28 = arith.constant 0.000000e+00 : f32
    %36 = vector.broadcast %cst_28 : f32 to vector<8x128xf32>
    %37 = arith.maximumf %35, %36 : vector<8x128xf32>
    %c0_29 = arith.constant 0 : index
    %c0_30 = arith.constant 0 : index
    %38 = vector.load %arg11[%c0_29, %c0_30] : memref<128x1xf32, #tpu.memory_space<vmem>>, vector<128x1xf32>
    %cst_31 = arith.constant dense<0.000000e+00> : vector<8x1xf32>
    %39 = tpu.matmul %37, %38, %cst_31 {dimension_numbers = #tpu.dot_dimension_numbers<[1], [0], [0], [1], [0, 0, 1, 1], [], []>} : vector<8x128xf32>, vector<128x1xf32>, vector<8x1xf32> -> vector<8x1xf32>
    %c0_32 = arith.constant 0 : index
    %c0_33 = arith.constant 0 : index
    %40 = vector.load %arg12[%c0_32, %c0_33] : memref<1x1xf32, #tpu.memory_space<vmem>>, vector<1x1xf32>
    %41 = vector.broadcast %40 : vector<1x1xf32> to vector<8x1xf32>
    %42 = arith.addf %39, %41 : vector<8x1xf32>
    %c0_34 = arith.constant 0 : index
    %c0_35 = arith.constant 0 : index
    %43 = vector.load %arg13[%c0_34, %c0_35] : memref<8x1xf32, #tpu.memory_space<vmem>>, vector<8x1xf32>
    tpu.vector_store %arg13[%c0_34, %c0_35], %42 {strides = array<i32>} : memref<8x1xf32, #tpu.memory_space<vmem>>, vector<8x1xf32>,
    return
  }
  func.func @transform_0(%arg0: i32) -> (i32, i32) {
    %c0_i32 = arith.constant 0 : i32
    %c0_i32_0 = arith.constant 0 : i32
    return %arg0, %c0_i32 : i32, i32
  }
  func.func @transform_1(%arg0: i32) -> (i32, i32) {
    %c0_i32 = arith.constant 0 : i32
    %c0_i32_0 = arith.constant 0 : i32
    %c0_i32_1 = arith.constant 0 : i32
    return %c0_i32, %c0_i32_0 : i32, i32
  }
  func.func @transform_2(%arg0: i32) -> (i32, i32) {
    %c0_i32 = arith.constant 0 : i32
    %c0_i32_0 = arith.constant 0 : i32
    %c0_i32_1 = arith.constant 0 : i32
    return %c0_i32, %c0_i32_0 : i32, i32
  }
  func.func @transform_3(%arg0: i32) -> (i32, i32) {
    %c0_i32 = arith.constant 0 : i32
    %c0_i32_0 = arith.constant 0 : i32
    %c0_i32_1 = arith.constant 0 : i32
    return %c0_i32, %c0_i32_0 : i32, i32
  }
  func.func @transform_4(%arg0: i32) -> (i32, i32) {
    %c0_i32 = arith.constant 0 : i32
    %c0_i32_0 = arith.constant 0 : i32
    %c0_i32_1 = arith.constant 0 : i32
    return %c0_i32, %c0_i32_0 : i32, i32
  }
  func.func @transform_5(%arg0: i32) -> (i32, i32) {
    %c0_i32 = arith.constant 0 : i32
    %c0_i32_0 = arith.constant 0 : i32
    %c0_i32_1 = arith.constant 0 : i32
    return %c0_i32, %c0_i32_0 : i32, i32
  }
  func.func @transform_6(%arg0: i32) -> (i32, i32) {
    %c0_i32 = arith.constant 0 : i32
    %c0_i32_0 = arith.constant 0 : i32
    %c0_i32_1 = arith.constant 0 : i32
    return %c0_i32, %c0_i32_0 : i32, i32
  }
  func.func @transform_7(%arg0: i32) -> (i32, i32) {
    %c0_i32 = arith.constant 0 : i32
    %c0_i32_0 = arith.constant 0 : i32
    %c0_i32_1 = arith.constant 0 : i32
    return %c0_i32, %c0_i32_0 : i32, i32
  }
  func.func @transform_8(%arg0: i32) -> (i32, i32) {
    %c0_i32 = arith.constant 0 : i32
    %c0_i32_0 = arith.constant 0 : i32
    %c0_i32_1 = arith.constant 0 : i32
    return %c0_i32, %c0_i32_0 : i32, i32
  }
  func.func @transform_9(%arg0: i32) -> (i32, i32) {
    %c0_i32 = arith.constant 0 : i32
    %c0_i32_0 = arith.constant 0 : i32
    %c0_i32_1 = arith.constant 0 : i32
    return %c0_i32, %c0_i32_0 : i32, i32
  }
  func.func @transform_10(%arg0: i32) -> (i32, i32) {
    %c0_i32 = arith.constant 0 : i32
    %c0_i32_0 = arith.constant 0 : i32
    %c0_i32_1 = arith.constant 0 : i32
    return %c0_i32, %c0_i32_0 : i32, i32
  }
  func.func @transform_11(%arg0: i32) -> (i32, i32) {
    %c0_i32 = arith.constant 0 : i32
    %c0_i32_0 = arith.constant 0 : i32
    %c0_i32_1 = arith.constant 0 : i32
    return %c0_i32, %c0_i32_0 : i32, i32
  }
  func.func @transform_12(%arg0: i32) -> (i32, i32) {
    %c0_i32 = arith.constant 0 : i32
    %c0_i32_0 = arith.constant 0 : i32
    return %arg0, %c0_i32 : i32, i32
  }
}

</mosaic_0001>

<bundles_post_ra>
// kernel: tpu_custom_call.1
= control target key start
LH: loop header
LB: loop body
LE: loop exit
PB: predicated region body
PF: predicated region fallthrough
CT: control target
= control target key end

     0   :  { %s1492_s0 = inlined_call_operand.vmem [shape: f32[8,75], index: 0, kind: input, shape index: {}]   ;;  %s1493_s1 = inlined_call_operand.hbm [shape: f32[75,75], index: 1, kind: input, shape index: {}]   ;;  %s1494_s2 = inlined_call_operand.hbm [shape: f32[75,128], index: 2, kind: input, shape index: {}]   ;;  %s1495_s3 = inlined_call_operand.vmem [shape: f32[1,128], index: 3, kind: input, shape index: {}]   ;;  %s1496_s4 = inlined_call_operand.vmem [shape: f32[128,128], index: 4, kind: input, shape index: {}]   ;;  %s1497_s5 = inlined_call_operand.vmem [shape: f32[1,128], index: 5, kind: input, shape index: {}]   ;;  %s1498_s6 = inlined_call_operand.hbm [shape: f32[128,128], index: 6, kind: input, shape index: {}]   ;;  %s1499_s7 = inlined_call_operand.vmem [shape: f32[1,128], index: 7, kind: input, shape index: {}]   ;;  %s1500_s8 = inlined_call_operand.hbm [shape: f32[128,128], index: 8, kind: input, shape index: {}]   ;;  %s1501_s9 = inlined_call_operand.vmem [shape: f32[1,128], index: 9, kind: input, shape index: {}]   ;;  %s1502_s10 = inlined_call_operand.vmem [shape: f32[128,1], index: 10, kind: input, shape index: {}]   ;;  %s1503_s11 = inlined_call_operand.<no memory space> [shape: f32[1,1], index: 11, kind: input, shape index: {}]   ;;  %s1504_s12 = inlined_call_operand.vmem [shape: f32[8,1], index: 12, kind: output, shape index: {}]  }
   0x1   :  { %v17_v0 = vstv %s1503_s11 }
   0x2   :  { %18 = vst [vmem:[#allocation2] sm:$0x1] %v17_v0 }
   0x3   :  { %19 = vsyncpa [#allocation4], 0 }
   0x4   :  { %20 = vsyncpa [#allocation6], 0 }
   0x5   :  { %21 = vsyncpa [#allocation9], 0  ;;  %s1159_s23 = smov [#allocation5]   ;;  %s1160_s25 = smov [#allocation3]  }
   0x6   :  { %s41_s24 = sshll.u32 %s1159_s23, 4  ;;  %s29_s26 = sshll.u32 %s1160_s25, 4  ;;  %s42_s24 = int_to_ptr.vmem [resolvable:$true] %s41_s24  ;;  %s30_s26 = int_to_ptr.vmem [resolvable:$true] %s29_s26 }
   0x7   :  { %s1081_s27 = scalar_lea.vmem %s42_s24, 1280  ;;  %p1086_p1 = scmp.lt.s32.totalorder %s42_s24, %s42_s24 }
   0x8   :  { %p1082_p0 = scmp.ne.s32.totalorder %s42_s24, %s1081_s27  ;;  %p1087_p2 = scmp.lt.s32.totalorder %s1081_s27, %s1081_s27 }
   0xa   :  { %p1088_p3 = por %p1087_p2, %p1086_p1 }
   0xc   :  { %p1089_p4 = pnand %p1088_p3, %p1082_p0 }
   0xe   :  { %1092 = shalt.err (!%p1089_p4)
}
   0xf   :  { %s1161_s28 = smov 128   ;;  %s1162_s29 = smov 8  }
  0x10   :  { %47 = dma.hbm_to_vmem [thread:$0]  %s1494_s2, 1280, %s42_s24, [#allocation6], %s1161_s28, %s1161_s28, %s1162_s29  }
  0x11   :  { %s1101_s13 = scalar_lea.vmem %s30_s26, 1280  ;;  %p1106_p6 = scmp.lt.s32.totalorder %s30_s26, %s30_s26 }
  0x12   :  { %p1102_p5 = scmp.ne.s32.totalorder %s30_s26, %s1101_s13  ;;  %p1107_p7 = scmp.lt.s32.totalorder %s1101_s13, %s1101_s13 }
  0x14   :  { %p1108_p8 = por %p1107_p7, %p1106_p6 }
  0x16   :  { %p1109_p9 = pnand %p1108_p8, %p1102_p5 }
  0x18   :  { %1112 = shalt.err (!%p1109_p9)
}
  0x19   :  { %35 = dma.hbm_to_vmem [thread:$0]  %s1493_s1, 1280, %s30_s26, [#allocation4], %s1161_s28, %s1161_s28, %s1162_s29  }
  0x1a   :  { %s1163_s16 = smov [#allocation7]   ;;  %s1164_s18 = smov [#allocation8]  }
  0x1b   :  { %s59_s17 = sshll.u32 %s1163_s16, 4  ;;  %s73_s19 = sshll.u32 %s1164_s18, 4  ;;  %s60_s17 = int_to_ptr.vmem [resolvable:$true] %s59_s17  ;;  %s74_s19 = int_to_ptr.vmem [resolvable:$true] %s73_s19 }
  0x1c   :  { %s1121_s2 = scalar_lea.vmem %s60_s17, 2048  ;;  %p1126_p11 = scmp.lt.s32.totalorder %s60_s17, %s60_s17 }
  0x1d   :  { %p1122_p10 = scmp.ne.s32.totalorder %s60_s17, %s1121_s2  ;;  %p1127_p12 = scmp.lt.s32.totalorder %s1121_s2, %s1121_s2 }
  0x1f   :  { %p1128_p13 = por %p1127_p12, %p1126_p11 }
  0x21   :  { %p1129_p0 = pnand %p1128_p13, %p1122_p10 }
  0x23   :  { %1132 = shalt.err (!%p1129_p0)
}
  0x24   :  { %65 = dma.hbm_to_vmem [thread:$0]  %s1498_s6, 2048, %s60_s17, [#allocation6], %s1161_s28, %s1161_s28, %s1162_s29  }
  0x25   :  { %s1141_s1 = scalar_lea.vmem %s74_s19, 2048  ;;  %p1146_p2 = scmp.lt.s32.totalorder %s74_s19, %s74_s19 }
  0x26   :  { %p1142_p1 = scmp.ne.s32.totalorder %s74_s19, %s1141_s1  ;;  %p1147_p3 = scmp.lt.s32.totalorder %s1141_s1, %s1141_s1 }
  0x28   :  { %p1148_p4 = por %p1147_p3, %p1146_p2 }
  0x2a   :  { %p1149_p5 = pnand %p1148_p4, %p1142_p1 }
  0x2c   :  { %1152 = shalt.err (!%p1149_p5)
}
  0x2d   :  { %79 = dma.hbm_to_vmem [thread:$0]  %s1500_s8, 2048, %s74_s19, [#allocation9], %s1161_s28, %s1161_s28, %s1162_s29  }
  0x2e   :  { %1153 = dma.done.wait [#allocation4], 1280  }
  0x2f   :  { %1154 = vsyncadd [#allocation4], 4294966016 }
  0x30   :  { %1155 = dma.done.wait [#allocation6], 3328  }
  0x31   :  { %1156 = vsyncadd [#allocation6], 4294963968 }
  0x32   :  { %1157 = dma.done.wait [#allocation9], 2048  }
  0x33   :  { %1158 = vsyncadd [#allocation9], 4294965248  ;;  %v1165_v1 = vmov 0.0   ;;  %vm1166_vm0 = vmmov 0   ;;  %vm113_vm1 = vcmask 1042432   ;;  %v107_v3 = vld [vmem:[#allocation3 + $0x40] sm:$0xff] }
  0x34   :  { %854 = vmatprep.subr.mxu0 %v1165_v1  ;;  %874 = vmatprep.mubr.msk.f32.mxu0 %vm1166_vm0, %v1165_v1  ;;  %v108_v2 = vld [vmem:[#allocation3 + $0x48] sm:$0x7]  ;;  %v106_v4 = vld [vmem:[#allocation3 + $0x38] sm:$0xff]  ;;  %v105_v5 = vld [vmem:[#allocation3 + $0x30] sm:$0xff]  ;;  %vm109_vm2 = vcmask 613376   ;;  %vm733_vm3 = vcmask 7168  }
  0x35   :  { %877 = vmatprep.subr.mxu1 %v1165_v1  ;;  %897 = vmatprep.mubr.msk.f32.mxu1 %vm1166_vm0, %v1165_v1  ;;  %v104_v6 = vld [vmem:[#allocation3 + $0x28] sm:$0xff]  ;;  %v103_v7 = vld [vmem:[#allocation3 + $0x20] sm:$0xff]  ;;  %v102_v8 = vld [vmem:[#allocation3 + $0x18] sm:$0xff] }
  0x36   :  { %855 = vmatpush3.msk.msra.mxu0 %vm113_vm1, %v108_v2  ;;  %878 = vmatpush3.msk.msra.mxu1 %vm113_vm1, %v108_v2  ;;  %v101_v9 = vld [vmem:[#allocation3 + $0x10] sm:$0xff]  ;;  %v100_v10 = vld [vmem:[#allocation3 + $0x8] sm:$0xff]  ;;  %v99_v11 = vld [vmem:[#allocation3] sm:$0xff] }
  0x37   :  { %856 = vmatprep.subr.mxu0 %v1165_v1  ;;  %879 = vmatprep.subr.mxu1 %v1165_v1  ;;  %v98_v12 = vld [vmem:[%s1492_s0] sm:$0xff]  ;;  %v273_v17 = vld [vmem:[#allocation5 + $0x48] sm:$0x7]  ;;  %v272_v18 = vld [vmem:[#allocation5 + $0x40] sm:$0xff] }
  0x38   :  { %857 = vmatpush3.msra.mxu0 %v107_v3  ;;  %880 = vmatpush3.msra.mxu1 %v107_v3  ;;  %v271_v19 = vld [vmem:[#allocation5 + $0x38] sm:$0xff]  ;;  %v270_v20 = vld [vmem:[#allocation5 + $0x30] sm:$0xff]  ;;  %v269_v21 = vld [vmem:[#allocation5 + $0x28] sm:$0xff] }
  0x39   :  { %858 = vmatprep.subr.mxu0 %v1165_v1  ;;  %881 = vmatprep.subr.mxu1 %v1165_v1  ;;  %v268_v22 = vld [vmem:[#allocation5 + $0x20] sm:$0xff]  ;;  %v267_v23 = vld [vmem:[#allocation5 + $0x18] sm:$0xff]  ;;  %v266_v24 = vld [vmem:[#allocation5 + $0x10] sm:$0xff] }
  0x3a   :  { %859 = vmatpush3.msra.mxu0 %v106_v4  ;;  %882 = vmatpush3.msra.mxu1 %v106_v4  ;;  %v265_v25 = vld [vmem:[#allocation5 + $0x8] sm:$0xff]  ;;  %v264_v26 = vld [vmem:[#allocation5] sm:$0xff]  ;;  %v371_v29 = vld [vmem:[%s1496_s4 + $0x68] sm:$0xff] }
  0x3b   :  { %860 = vmatprep.subr.mxu0 %v1165_v1  ;;  %883 = vmatprep.subr.mxu1 %v1165_v1  ;;  %v373_v27 = vld [vmem:[%s1496_s4 + $0x78] sm:$0xff]  ;;  %v372_v28 = vld [vmem:[%s1496_s4 + $0x70] sm:$0xff]  ;;  %v370_v30 = vld [vmem:[%s1496_s4 + $0x60] sm:$0xff] }
  0x3c   :  { %861 = vmatpush3.msra.mxu0 %v105_v5  ;;  %884 = vmatpush3.msra.mxu1 %v105_v5  ;;  %v369_v31 = vld [vmem:[%s1496_s4 + $0x58] sm:$0xff]  ;;  %v368_v32 = vld [vmem:[%s1496_s4 + $0x50] sm:$0xff]  ;;  %v367_v33 = vld [vmem:[%s1496_s4 + $0x48] sm:$0xff] }
  0x3d   :  { %862 = vmatprep.subr.mxu0 %v1165_v1  ;;  %885 = vmatprep.subr.mxu1 %v1165_v1  ;;  %v366_v34 = vld [vmem:[%s1496_s4 + $0x40] sm:$0xff]  ;;  %v365_v35 = vld [vmem:[%s1496_s4 + $0x38] sm:$0xff]  ;;  %v364_v36 = vld [vmem:[%s1496_s4 + $0x30] sm:$0xff] }
  0x3e   :  { %863 = vmatpush3.msra.mxu0 %v104_v6  ;;  %886 = vmatpush3.msra.mxu1 %v104_v6  ;;  %v363_v37 = vld [vmem:[%s1496_s4 + $0x28] sm:$0xff]  ;;  %v362_v38 = vld [vmem:[%s1496_s4 + $0x20] sm:$0xff]  ;;  %v361_v39 = vld [vmem:[%s1496_s4 + $0x18] sm:$0xff] }
  0x3f   :  { %864 = vmatprep.subr.mxu0 %v1165_v1  ;;  %887 = vmatprep.subr.mxu1 %v1165_v1  ;;  %v360_v45 = vld [vmem:[%s1496_s4 + $0x10] sm:$0xff]  ;;  %v359_v46 = vld [vmem:[%s1496_s4 + $0x8] sm:$0xff]  ;;  %v358_v47 = vld [vmem:[%s1496_s4] sm:$0xff] }
  0x40   :  { %865 = vmatpush3.msra.mxu0 %v103_v7  ;;  %888 = vmatpush3.msra.mxu1 %v103_v7  ;;  %v467_v48 = vld [vmem:[#allocation7 + $0x78] sm:$0xff]  ;;  %v466_v49 = vld [vmem:[#allocation7 + $0x70] sm:$0xff]  ;;  %v465_v50 = vld [vmem:[#allocation7 + $0x68] sm:$0xff] }
  0x41   :  { %866 = vmatprep.subr.mxu0 %v1165_v1  ;;  %889 = vmatprep.subr.mxu1 %v1165_v1  ;;  %v464_v51 = vld [vmem:[#allocation7 + $0x60] sm:$0xff]  ;;  %v463_v52 = vld [vmem:[#allocation7 + $0x58] sm:$0xff]  ;;  %v462_v53 = vld [vmem:[#allocation7 + $0x50] sm:$0xff] }
  0x42   :  { %867 = vmatpush3.msra.mxu0 %v102_v8  ;;  %890 = vmatpush3.msra.mxu1 %v102_v8  ;;  %v461_v54 = vld [vmem:[#allocation7 + $0x48] sm:$0xff]  ;;  %v460_v55 = vld [vmem:[#allocation7 + $0x40] sm:$0xff]  ;;  %v459_v56 = vld [vmem:[#allocation7 + $0x38] sm:$0xff] }
  0x43   :  { %868 = vmatprep.subr.mxu0 %v1165_v1  ;;  %891 = vmatprep.subr.mxu1 %v1165_v1  ;;  %v458_v57 = vld [vmem:[#allocation7 + $0x30] sm:$0xff]  ;;  %v457_v58 = vld [vmem:[#allocation7 + $0x28] sm:$0xff]  ;;  %v456_v59 = vld [vmem:[#allocation7 + $0x20] sm:$0xff] }
  0x44   :  { %869 = vmatpush3.msra.mxu0 %v101_v9  ;;  %892 = vmatpush3.msra.mxu1 %v101_v9  ;;  %v455_v60 = vld [vmem:[#allocation7 + $0x18] sm:$0xff]  ;;  %v454_v3 = vld [vmem:[#allocation7 + $0x10] sm:$0xff]  ;;  %v453_v4 = vld [vmem:[#allocation7 + $0x8] sm:$0xff] }
  0x45   :  { %870 = vmatprep.subr.mxu0 %v1165_v1  ;;  %893 = vmatprep.subr.mxu1 %v1165_v1  ;;  %v746_v61 = vld [vmem:[%s1495_s3] ss:$0 sm:$0xff]  ;;  %v452_v5 = vld [vmem:[#allocation7] sm:$0xff]  ;;  %v560_v7 = vld [vmem:[#allocation8 + $0x70] sm:$0xff] }
  0x46   :  { %871 = vmatpush3.msra.mxu0 %v100_v10  ;;  %894 = vmatpush3.msra.mxu1 %v100_v10  ;;  %v561_v6 = vld [vmem:[#allocation8 + $0x78] sm:$0xff]  ;;  %v559_v8 = vld [vmem:[#allocation8 + $0x68] sm:$0xff]  ;;  %v558_v9 = vld [vmem:[#allocation8 + $0x60] sm:$0xff] }
  0x47   :  { %872 = vmatprep.subr.mxu0 %v1165_v1  ;;  %895 = vmatprep.subr.mxu1 %v1165_v1  ;;  %v557_v10 = vld [vmem:[#allocation8 + $0x58] sm:$0xff] }
  0x48   :  { %873 = vmatpush3.msra.mxu0 %v99_v11  ;;  %896 = vmatpush3.msra.mxu1 %v99_v11  ;;  %v556_v11 = vld [vmem:[#allocation8 + $0x50] sm:$0xff] }
  0x49   :  { %875 = vmatmul.mubr.msk.f32.vlgmr.msra.gmra.mxu0 %vm109_vm2, %v98_v12  ;;  %900 = vmatprep.subr.mxu0 %v1165_v1 }
  0x4a   :  { %920 = vmatprep.mubr.msk.f32.mxu0 %vm1166_vm0, %v1165_v1  ;;  %923 = vmatprep.subr.mxu1 %v1165_v1 }
  0x4b   :  { %901 = vmatpush3.msk.msra.mxu0 %vm113_vm1, %v273_v17  ;;  %v550_v17 = vld [vmem:[#allocation8 + $0x20] sm:$0xff] }
  0x4c   :  { %902 = vmatprep.subr.mxu0 %v1165_v1 }
  0x4d   :  { %903 = vmatpush3.msra.mxu0 %v272_v18  ;;  %v549_v18 = vld [vmem:[#allocation8 + $0x18] sm:$0xff] }
  0x4e   :  { %904 = vmatprep.subr.mxu0 %v1165_v1 }
  0x4f   :  { %905 = vmatpush3.msra.mxu0 %v271_v19  ;;  %v749_v19 = vld [vmem:[%s1497_s5] ss:$0 sm:$0xff] }
  0x50   :  { %906 = vmatprep.subr.mxu0 %v1165_v1 }
  0x51   :  { %907 = vmatpush3.msra.mxu0 %v270_v20 }
  0x52   :  { %908 = vmatprep.subr.mxu0 %v1165_v1 }
  0x53   :  { %909 = vmatpush3.msra.mxu0 %v269_v21 }
  0x54   :  { %910 = vmatprep.subr.mxu0 %v1165_v1 }
  0x55   :  { %911 = vmatpush3.msra.mxu0 %v268_v22 }
  0x56   :  { %912 = vmatprep.subr.mxu0 %v1165_v1 }
  0x57   :  { %913 = vmatpush3.msra.mxu0 %v267_v23 }
  0x58   :  { %914 = vmatprep.subr.mxu0 %v1165_v1 }
  0x59   :  { %915 = vmatpush3.msra.mxu0 %v266_v24  ;;  %v548_v24 = vld [vmem:[#allocation8 + $0x10] sm:$0xff] }
  0x5a   :  { %916 = vmatprep.subr.mxu0 %v1165_v1 }
  0x5b   :  { %917 = vmatpush3.msra.mxu0 %v265_v25  ;;  %v547_v25 = vld [vmem:[#allocation8 + $0x8] sm:$0xff] }
  0x5c   :  { %918 = vmatprep.subr.mxu0 %v1165_v1 }
  0x5d   :  { %919 = vmatpush3.msra.mxu0 %v264_v26  ;;  %v546_v26 = vld [vmem:[#allocation8] sm:$0xff] }
  0x5e   :  { %958 = vmatprep.subr.mxu0 %v1165_v1 }
 0x109   :  { %v183_v13 = vpop.f32.mrf.mxu0 }
 0x10a   :  { %v1293_v14 = vsub.f32 %v98_v12, %v183_v13  ;;  %v555_v12 = vld [vmem:[#allocation8 + $0x48] sm:$0xff]  ;;  %v554_v13 = vld [vmem:[#allocation8 + $0x40] sm:$0xff] }
 0x10b   :  { %v876_v15 = vpop.f32.mrf.mxu0 }
 0x10c   :  { %v188_v16 = vmul.f32 %v1293_v14, %v1293_v14  ;;  %v552_v15 = vld [vmem:[#allocation8 + $0x30] sm:$0xff] }
 0x10e   :  { %898 = vmatmul.mubr.msk.f32.vlgmr.msra.gmra.mxu1 %vm109_vm2, %v188_v16  ;;  %v551_v16 = vld [vmem:[#allocation8 + $0x28] sm:$0xff] }
 0x10f   :  { %955 = vmatprep.mubr.msk.f32.mxu1 %vm1166_vm0, %v1165_v1  ;;  %924 = vmatpush3.msra.mxu1 %v373_v27  ;;  %v655_v27 = vld [vmem:[%s1502_s10 + $0x78] sm:$0xff] }
 0x110   :  { %925 = vmatprep.subr.mxu1 %v1165_v1 }
 0x111   :  { %926 = vmatpush3.msra.mxu1 %v372_v28  ;;  %v654_v28 = vld [vmem:[%s1502_s10 + $0x70] sm:$0xff] }
 0x112   :  { %927 = vmatprep.subr.mxu1 %v1165_v1 }
 0x113   :  { %928 = vmatpush3.msra.mxu1 %v371_v29  ;;  %v653_v29 = vld [vmem:[%s1502_s10 + $0x68] sm:$0xff] }
 0x114   :  { %929 = vmatprep.subr.mxu1 %v1165_v1 }
 0x115   :  { %930 = vmatpush3.msra.mxu1 %v370_v30  ;;  %v652_v30 = vld [vmem:[%s1502_s10 + $0x60] sm:$0xff] }
 0x116   :  { %931 = vmatprep.subr.mxu1 %v1165_v1 }
 0x117   :  { %932 = vmatpush3.msra.mxu1 %v369_v31  ;;  %v651_v31 = vld [vmem:[%s1502_s10 + $0x58] sm:$0xff] }
 0x118   :  { %933 = vmatprep.subr.mxu1 %v1165_v1 }
 0x119   :  { %934 = vmatpush3.msra.mxu1 %v368_v32  ;;  %v650_v32 = vld [vmem:[%s1502_s10 + $0x50] sm:$0xff] }
 0x11a   :  { %935 = vmatprep.subr.mxu1 %v1165_v1 }
 0x11b   :  { %936 = vmatpush3.msra.mxu1 %v367_v33  ;;  %v649_v33 = vld [vmem:[%s1502_s10 + $0x48] sm:$0xff] }
 0x11c   :  { %937 = vmatprep.subr.mxu1 %v1165_v1 }
 0x11d   :  { %938 = vmatpush3.msra.mxu1 %v366_v34  ;;  %v648_v34 = vld [vmem:[%s1502_s10 + $0x40] sm:$0xff] }
 0x11e   :  { %939 = vmatprep.subr.mxu1 %v1165_v1 }
 0x11f   :  { %940 = vmatpush3.msra.mxu1 %v365_v35  ;;  %v647_v35 = vld [vmem:[%s1502_s10 + $0x38] sm:$0xff] }
 0x120   :  { %941 = vmatprep.subr.mxu1 %v1165_v1 }
 0x121   :  { %942 = vmatpush3.msra.mxu1 %v364_v36  ;;  %v646_v36 = vld [vmem:[%s1502_s10 + $0x30] sm:$0xff] }
 0x122   :  { %943 = vmatprep.subr.mxu1 %v1165_v1 }
 0x123   :  { %944 = vmatpush3.msra.mxu1 %v363_v37  ;;  %v645_v37 = vld [vmem:[%s1502_s10 + $0x28] sm:$0xff] }
 0x124   :  { %945 = vmatprep.subr.mxu1 %v1165_v1 }
 0x125   :  { %946 = vmatpush3.msra.mxu1 %v362_v38  ;;  %v644_v38 = vld [vmem:[%s1502_s10 + $0x20] sm:$0xff] }
 0x126   :  { %947 = vmatprep.subr.mxu1 %v1165_v1 }
 0x127   :  { %948 = vmatpush3.msra.mxu1 %v361_v39  ;;  %v643_v39 = vld [vmem:[%s1502_s10 + $0x18] sm:$0xff] }
 0x128   :  { %949 = vmatprep.subr.mxu1 %v1165_v1 }
 0x129   :  { %950 = vmatpush3.msra.mxu1 %v360_v45  ;;  %v642_v45 = vld [vmem:[%s1502_s10 + $0x10] sm:$0xff] }
 0x12a   :  { %951 = vmatprep.subr.mxu1 %v1165_v1 }
 0x12b   :  { %952 = vmatpush3.msra.mxu1 %v359_v46  ;;  %v641_v46 = vld [vmem:[%s1502_s10 + $0x8] sm:$0xff] }
 0x12c   :  { %953 = vmatprep.subr.mxu1 %v1165_v1 }
 0x12d   :  { %954 = vmatpush3.msra.mxu1 %v358_v47  ;;  %v640_v47 = vld [vmem:[%s1502_s10] sm:$0xff] }
 0x12e   :  { %993 = vmatprep.subr.mxu1 %v1165_v1 }
 0x1ce   :  { %v258_v40 = vpop.f32.mrf.mxu1 }
 0x1cf   :  { %v259_v41 = vadd.f32 1e-05, %v258_v40  ;;  %v750_v40 = vld [vmem:[%s1499_s7] ss:$0 sm:$0xff] }
 0x1d0   :  { %v899_v42 = vpop.f32.mrf.mxu1 }
 0x1d1   :  { %1071 = vrsqrt.f32 %v259_v41 }
 0x1de   :  { %v1072_v43 = vpop.eup %1071 }
 0x1df   :  { %v263_v44 = vmul.f32 %v1072_v43, %v1293_v14  ;;  %v553_v14 = vld [vmem:[#allocation8 + $0x38] sm:$0xff] }
 0x1e1   :  { %921 = vmatmul.mubr.msk.f32.vlgmr.msra.gmra.mxu0 %vm109_vm2, %v263_v44 }
 0x1e2   :  { %990 = vmatprep.mubr.msk.f32.mxu0 %vm1166_vm0, %v1165_v1  ;;  %959 = vmatpush3.msra.mxu0 %v467_v48  ;;  %v751_v48 = vld [vmem:[%s1501_s9] ss:$0 sm:$0xff] }
 0x1e3   :  { %960 = vmatprep.subr.mxu0 %v1165_v1 }
 0x1e4   :  { %961 = vmatpush3.msra.mxu0 %v466_v49 }
 0x1e5   :  { %962 = vmatprep.subr.mxu0 %v1165_v1 }
 0x1e6   :  { %963 = vmatpush3.msra.mxu0 %v465_v50 }
 0x1e7   :  { %964 = vmatprep.subr.mxu0 %v1165_v1 }
 0x1e8   :  { %965 = vmatpush3.msra.mxu0 %v464_v51 }
 0x1e9   :  { %966 = vmatprep.subr.mxu0 %v1165_v1 }
 0x1ea   :  { %967 = vmatpush3.msra.mxu0 %v463_v52 }
 0x1eb   :  { %968 = vmatprep.subr.mxu0 %v1165_v1 }
 0x1ec   :  { %969 = vmatpush3.msra.mxu0 %v462_v53  ;;  %v752_v53 = vld [vmem:[#allocation2] ss:$0 sm:$0xff] }
 0x1ed   :  { %970 = vmatprep.subr.mxu0 %v1165_v1 }
 0x1ee   :  { %971 = vmatpush3.msra.mxu0 %v461_v54 }
 0x1ef   :  { %972 = vmatprep.subr.mxu0 %v1165_v1 }
 0x1f0   :  { %973 = vmatpush3.msra.mxu0 %v460_v55 }
 0x1f1   :  { %974 = vmatprep.subr.mxu0 %v1165_v1 }
 0x1f2   :  { %975 = vmatpush3.msra.mxu0 %v459_v56 }
 0x1f3   :  { %976 = vmatprep.subr.mxu0 %v1165_v1 }
 0x1f4   :  { %977 = vmatpush3.msra.mxu0 %v458_v57 }
 0x1f5   :  { %978 = vmatprep.subr.mxu0 %v1165_v1 }
 0x1f6   :  { %979 = vmatpush3.msra.mxu0 %v457_v58 }
 0x1f7   :  { %980 = vmatprep.subr.mxu0 %v1165_v1 }
 0x1f8   :  { %981 = vmatpush3.msra.mxu0 %v456_v59 }
 0x1f9   :  { %982 = vmatprep.subr.mxu0 %v1165_v1 }
 0x1fa   :  { %983 = vmatpush3.msra.mxu0 %v455_v60 }
 0x1fb   :  { %984 = vmatprep.subr.mxu0 %v1165_v1 }
 0x1fc   :  { %985 = vmatpush3.msra.mxu0 %v454_v3 }
 0x1fd   :  { %986 = vmatprep.subr.mxu0 %v1165_v1 }
 0x1fe   :  { %987 = vmatpush3.msra.mxu0 %v453_v4 }
 0x1ff   :  { %988 = vmatprep.subr.mxu0 %v1165_v1 }
 0x200   :  { %989 = vmatpush3.msra.mxu0 %v452_v5 }
 0x201   :  { %1028 = vmatprep.subr.mxu0 %v1165_v1 }
 0x2a1   :  { %v353_v62 = vpop.f32.mrf.mxu0 }
 0x2a2   :  { %v354_v63 = vadd.f32 %v746_v61, %v353_v62 }
 0x2a3   :  { %v922_v0 = vpop.f32.mrf.mxu0 }
 0x2a4   :  { %v357_v2 = vmax.f32 %v354_v63, 0.0 }
 0x2a6   :  { %956 = vmatmul.mubr.f32.vlgmr.msra.gmra.mxu1 %v357_v2 }
 0x2a7   :  { %1025 = vmatprep.mubr.msk.f32.mxu1 %vm1166_vm0, %v1165_v1  ;;  %994 = vmatpush3.msra.mxu1 %v561_v6 }
 0x2a8   :  { %995 = vmatprep.subr.mxu1 %v1165_v1 }
 0x2a9   :  { %996 = vmatpush3.msra.mxu1 %v560_v7 }
 0x2aa   :  { %997 = vmatprep.subr.mxu1 %v1165_v1 }
 0x2ab   :  { %998 = vmatpush3.msra.mxu1 %v559_v8 }
 0x2ac   :  { %999 = vmatprep.subr.mxu1 %v1165_v1 }
 0x2ad   :  { %1000 = vmatpush3.msra.mxu1 %v558_v9 }
 0x2ae   :  { %1001 = vmatprep.subr.mxu1 %v1165_v1 }
 0x2af   :  { %1002 = vmatpush3.msra.mxu1 %v557_v10 }
 0x2b0   :  { %1003 = vmatprep.subr.mxu1 %v1165_v1 }
 0x2b1   :  { %1004 = vmatpush3.msra.mxu1 %v556_v11 }
 0x2b2   :  { %1005 = vmatprep.subr.mxu1 %v1165_v1 }
 0x2b3   :  { %1006 = vmatpush3.msra.mxu1 %v555_v12 }
 0x2b4   :  { %1007 = vmatprep.subr.mxu1 %v1165_v1 }
 0x2b5   :  { %1008 = vmatpush3.msra.mxu1 %v554_v13 }
 0x2b6   :  { %1009 = vmatprep.subr.mxu1 %v1165_v1 }
 0x2b7   :  { %1010 = vmatpush3.msra.mxu1 %v553_v14 }
 0x2b8   :  { %1011 = vmatprep.subr.mxu1 %v1165_v1 }
 0x2b9   :  { %1012 = vmatpush3.msra.mxu1 %v552_v15 }
 0x2ba   :  { %1013 = vmatprep.subr.mxu1 %v1165_v1 }
 0x2bb   :  { %1014 = vmatpush3.msra.mxu1 %v551_v16 }
 0x2bc   :  { %1015 = vmatprep.subr.mxu1 %v1165_v1 }
 0x2bd   :  { %1016 = vmatpush3.msra.mxu1 %v550_v17 }
 0x2be   :  { %1017 = vmatprep.subr.mxu1 %v1165_v1 }
 0x2bf   :  { %1018 = vmatpush3.msra.mxu1 %v549_v18 }
 0x2c0   :  { %1019 = vmatprep.subr.mxu1 %v1165_v1 }
 0x2c1   :  { %1020 = vmatpush3.msra.mxu1 %v548_v24 }
 0x2c2   :  { %1021 = vmatprep.subr.mxu1 %v1165_v1 }
 0x2c3   :  { %1022 = vmatpush3.msra.mxu1 %v547_v25 }
 0x2c4   :  { %1023 = vmatprep.subr.mxu1 %v1165_v1 }
 0x2c5   :  { %1024 = vmatpush3.msra.mxu1 %v546_v26 }
 0x366   :  { %v447_v20 = vpop.f32.mrf.mxu1 }
 0x367   :  { %v448_v21 = vadd.f32 %v749_v19, %v447_v20 }
 0x368   :  { %v957_v22 = vpop.f32.mrf.mxu1 }
 0x369   :  { %v451_v23 = vmax.f32 %v448_v21, 0.0 }
 0x36b   :  { %991 = vmatmul.mubr.f32.vlgmr.msra.gmra.mxu0 %v451_v23 }
 0x36c   :  { %1060 = vmatprep.mubr.msk.f32.mxu0 %vm1166_vm0, %v1165_v1  ;;  %1029 = vmatpush3.msra.mxu0 %v655_v27 }
 0x36d   :  { %1030 = vmatprep.subr.mxu0 %v1165_v1 }
 0x36e   :  { %1031 = vmatpush3.msra.mxu0 %v654_v28 }
 0x36f   :  { %1032 = vmatprep.subr.mxu0 %v1165_v1 }
 0x370   :  { %1033 = vmatpush3.msra.mxu0 %v653_v29 }
 0x371   :  { %1034 = vmatprep.subr.mxu0 %v1165_v1 }
 0x372   :  { %1035 = vmatpush3.msra.mxu0 %v652_v30 }
 0x373   :  { %1036 = vmatprep.subr.mxu0 %v1165_v1 }
 0x374   :  { %1037 = vmatpush3.msra.mxu0 %v651_v31 }
 0x375   :  { %1038 = vmatprep.subr.mxu0 %v1165_v1 }
 0x376   :  { %1039 = vmatpush3.msra.mxu0 %v650_v32 }
 0x377   :  { %1040 = vmatprep.subr.mxu0 %v1165_v1 }
 0x378   :  { %1041 = vmatpush3.msra.mxu0 %v649_v33 }
 0x379   :  { %1042 = vmatprep.subr.mxu0 %v1165_v1 }
 0x37a   :  { %1043 = vmatpush3.msra.mxu0 %v648_v34 }
 0x37b   :  { %1044 = vmatprep.subr.mxu0 %v1165_v1 }
 0x37c   :  { %1045 = vmatpush3.msra.mxu0 %v647_v35 }
 0x37d   :  { %1046 = vmatprep.subr.mxu0 %v1165_v1 }
 0x37e   :  { %1047 = vmatpush3.msra.mxu0 %v646_v36 }
 0x37f   :  { %1048 = vmatprep.subr.mxu0 %v1165_v1 }
 0x380   :  { %1049 = vmatpush3.msra.mxu0 %v645_v37 }
 0x381   :  { %1050 = vmatprep.subr.mxu0 %v1165_v1 }
 0x382   :  { %1051 = vmatpush3.msra.mxu0 %v644_v38 }
 0x383   :  { %1052 = vmatprep.subr.mxu0 %v1165_v1 }
 0x384   :  { %1053 = vmatpush3.msra.mxu0 %v643_v39 }
 0x385   :  { %1054 = vmatprep.subr.mxu0 %v1165_v1 }
 0x386   :  { %1055 = vmatpush3.msra.mxu0 %v642_v45 }
 0x387   :  { %1056 = vmatprep.subr.mxu0 %v1165_v1 }
 0x388   :  { %1057 = vmatpush3.msra.mxu0 %v641_v46 }
 0x389   :  { %1058 = vmatprep.subr.mxu0 %v1165_v1 }
 0x38a   :  { %1059 = vmatpush3.msra.mxu0 %v640_v47 }
 0x42b   :  { %v541_v41 = vpop.f32.mrf.mxu0 }
 0x42c   :  { %v542_v42 = vadd.f32 %v750_v40, %v541_v41 }
 0x42d   :  { %v992_v43 = vpop.f32.mrf.mxu0 }
 0x42e   :  { %v545_v44 = vmax.f32 %v542_v42, 0.0 }
 0x430   :  { %1026 = vmatmul.mubr.f32.vlgmr.msra.gmra.mxu1 %v545_v44 }
 0x4f0   :  { %v635_v49 = vpop.f32.mrf.mxu1 }
 0x4f1   :  { %v636_v50 = vadd.f32 %v751_v48, %v635_v49 }
 0x4f2   :  { %v1027_v51 = vpop.f32.mrf.mxu1 }
 0x4f3   :  { %v639_v52 = vmax.f32 %v636_v50, 0.0 }
 0x4f5   :  { %1061 = vmatmul.mubr.f32.vlgmr.msra.gmra.mxu0 %v639_v52 }
 0x5b5   :  { %v729_v54 = vpop.f32.mrf.mxu0 }
 0x5b6   :  { %v730_v55 = vadd.f32 %v752_v53, %v729_v54 }
 0x5b7   :  { %v1062_v56 = vpop.f32.mrf.mxu0 }
 0x5b8   :  { %734 = vst.msk [vmem:[%s1504_s12] sm:$0xff] %vm733_vm3, %v730_v55 }
 0x5b9   :  { %739 = vsyncpa [#allocation4], 1 }
 0x5ba   :  { %740 = vsyncpa [#allocation6], 1 }
 0x5bb   :  { %741 = vsyncpa [#allocation9], 1 }

</bundles_post_ra>
